<compile_context>
chip_gen: v7x
topology: tpu7x:2x2x1
jax: 0.10.0
libtpu: 0.0.40
codegen_flags: <defaults>
</compile_context>

<pallas_src>
import functools

import jax
import jax.numpy as jnp
from jax.experimental import pallas as pl
from jax.experimental.pallas import tpu as pltpu


def _pixel_shuffle_kernel(x_ref, p_ref, o_ref, *, r: int, num_i: int, chunk: int):
    """One grid step of PixelShuffle.

    x_ref: (num_i * r, TH, TW)      input channel planes
    p_ref: (r, chunk, chunk*r)      one-hot perms, P[j, w, w*r + j] = 1 (resident)
    o_ref: (TH, num_i * TW * r)     dense output rows (merged (i, W*r) view)
    """
    tw = x_ref.shape[-1]
    nchunks = tw // chunk
    cdt = p_ref.dtype
    for ii in range(num_i):           # static unroll: 1 (i in grid) or r (small W)
        for wc in range(nchunks):     # static unroll: <= 4 (tw <= 512, chunk = 128)
            lo = wc * chunk
            acc = None
            for j in range(r):        # static unroll: r is small
                part = jnp.dot(
                    x_ref[ii * r + j, :, lo:lo + chunk].astype(cdt),
                    p_ref[j],
                    preferred_element_type=jnp.float32)
                acc = part if acc is None else acc + part
            col0 = ii * tw * r + lo * r
            o_ref[:, col0:col0 + chunk * r] = acc.astype(o_ref.dtype)


def _largest_divisor(n, cap, multiple_of=1):
    """Largest multiple of `multiple_of` dividing `n`, <= cap (or None)."""
    best = None
    m = multiple_of
    top = min(n, cap)
    while m <= top:
        if n % m == 0:
            best = m
        m += multiple_of
    return best


def _pick_tiles(h, w, r, itemsize):
    # Sublane packing: f32 -> 8 rows/tile, 16-bit -> 16, 8-bit -> 32.
    align = {4: 8, 2: 16, 1: 32}.get(itemsize, 8)

    if w % 128 == 0:
        # Lane-dense W tiling; matmul chunked to 128 lanes (small contraction).
        tw = _largest_divisor(w, 512, 128) or w
        chunk = 128
        num_i = 1          # row offset i becomes a grid axis
    else:
        # Small / odd W: keep the full width and all r row offsets per step so
        # every block equals the full trailing dims.
        tw = w
        chunk = w
        num_i = r

    # ~2 MiB output block per grid step (double-buffered in+out + tiny perm
    # stays well under the 32 MiB scoped-VMEM limit on all generations).
    budget = 2 * 1024 * 1024
    max_th = max(1, budget // max(1, tw * r * num_i * itemsize))
    th = (_largest_divisor(h, max_th, align)
          or _largest_divisor(h, max_th, 1)
          or h)
    return th, tw, chunk, num_i


def sub_pixel_forward(x: jax.Array, scale: int) -> jax.Array:
    """PixelShuffle(scale) on an NCHW tensor via a Pallas TPU kernel."""
    n, c, h, w = x.shape
    r = int(scale)
    r2 = r * r
    assert c % r2 == 0, "channels must be divisible by scale**2"
    c_out = c // r2
    itemsize = jnp.dtype(x.dtype).itemsize

    th, tw, chunk, num_i = _pick_tiles(h, w, r, itemsize)
    nh, nw = h // th, w // tw

    # v7x has 2 TensorCores sharded over parallel grid axes: make sure the
    # grid has at least 2 steps when possible.
    if num_i == r and n * c_out * nh < 2 and h > 1:
        align = {4: 8, 2: 16, 1: 32}.get(itemsize, 8)
        cand = (_largest_divisor(h, max(1, h // 2), align)
                or _largest_divisor(h, max(1, h // 2), 1))
        if cand:
            th = cand
            nh = h // th

    # Compute dtype for the (exact) one-hot matmuls.
    # TODO(synk): integer inputs with |x| >= 2**24 lose exactness through the
    # f32 one-hot matmul path.
    if x.dtype in (jnp.bfloat16, jnp.float32):
        cdt = x.dtype
    else:
        cdt = jnp.float32

    # One-hot column-interleave perms: P[j, w, w*r + j] = 1.  Small and
    # resident in VMEM (constant index_map).
    cols = (jnp.arange(chunk, dtype=jnp.int32)[None, :] * r
            + jnp.arange(r, dtype=jnp.int32)[:, None])          # (r, chunk)
    perm = jax.nn.one_hot(cols, chunk * r, dtype=cdt)            # (r, chunk, chunk*r)

    kernel = functools.partial(_pixel_shuffle_kernel, r=r, num_i=num_i, chunk=chunk)

    # Output is produced through the contiguous view (N, C_out, H, r*W*r):
    # element [n, c, h, i*W*r + W'] == out[n, c, h*r + i, W'].
    out_view_shape = (n, c_out, h, r * w * r)

    if num_i == 1:
        grid = (n, c_out, r, nh, nw)
        in_specs = [
            pl.BlockSpec((None, r, th, tw),
                         lambda ni, ci, ii, hi, wi: (ni, ci * r + ii, hi, wi)),
            pl.BlockSpec((r, chunk, chunk * r),
                         lambda ni, ci, ii, hi, wi: (0, 0, 0)),
        ]
        out_spec = pl.BlockSpec((None, None, th, tw * r),
                                lambda ni, ci, ii, hi, wi: (ni, ci, hi, ii * nw + wi))
    else:
        grid = (n, c_out, nh)
        in_specs = [
            pl.BlockSpec((None, r2, th, w),
                         lambda ni, ci, hi: (ni, ci, hi, 0)),
            pl.BlockSpec((r, chunk, chunk * r),
                         lambda ni, ci, hi: (0, 0, 0)),
        ]
        out_spec = pl.BlockSpec((None, None, th, r * w * r),
                                lambda ni, ci, hi: (ni, ci, hi, 0))

    out_view = pl.pallas_call(
        kernel,
        out_shape=jax.ShapeDtypeStruct(out_view_shape, x.dtype),
        grid=grid,
        in_specs=in_specs,
        out_specs=out_spec,
        compiler_params=pltpu.CompilerParams(
            dimension_semantics=("parallel",) * len(grid),
            vmem_limit_bytes=32 * 1024 * 1024),
        cost_estimate=pl.CostEstimate(
            flops=int(2 * r * chunk) * int(x.size),
            transcendentals=0,
            bytes_accessed=int(2 * x.size * itemsize)),
    )(x, perm)

    # Free reshape of contiguous memory back to the NCHW PixelShuffle layout.
    return out_view.reshape(n, c_out, h * r, w * r)


def _pixel_shuffle_ref(x: jax.Array, scale: int) -> jax.Array:
    # Pure-JAX reference (mirrors torch.nn.PixelShuffle semantics).
    n, c, h, w = x.shape
    r = scale
    c_out = c // (r * r)
    y = x.reshape(n, c_out, r, r, h, w)
    y = jnp.transpose(y, (0, 1, 4, 2, 5, 3))  # (N, C_out, H, r, W, r)
    return y.reshape(n, c_out, h * r, w * r)


if __name__ == "__main__":
    scale = 2
    N, C_OUT, H, W = 2, 1, 16, 16
    C_IN = C_OUT * scale * scale  # 4

    key = jax.random.PRNGKey(0)
    x = jax.random.normal(key, (N, C_IN, H, W), dtype=jnp.float32)

    out = jax.block_until_ready(sub_pixel_forward(x, scale))

    expected = _pixel_shuffle_ref(x, scale)
    assert out.shape == (N, C_OUT, H * scale, W * scale), out.shape
    assert out.dtype == x.dtype
    assert jnp.allclose(out, expected, atol=1e-6, rtol=0.0), "mismatch vs reference"

    print("KERNEL_OK")
</pallas_src>

<mosaic_0001>
module attributes {stable_mosaic.version = 11 : i64} {
  func.func @_pixel_shuffle_kernel(%arg0: i32, %arg1: i32, %arg2: i32, %arg3: memref<1x4x16x16xf32, #tpu.memory_space<vmem>>, %arg4: memref<2x16x32xf32, #tpu.memory_space<vmem>>, %arg5: memref<1x1x16x64xf32, #tpu.memory_space<vmem>>) attributes {dimension_semantics = [#tpu.dimension_semantics<parallel>, #tpu.dimension_semantics<parallel>, #tpu.dimension_semantics<parallel>], iteration_bounds = array<i64: 2, 1, 1>, scalar_prefetch = 0 : i64, scratch_operands = 0 : i64, tpu.core_type = #tpu.core_type<tc>, window_params = [{transform_indices = @transform_0, window_bounds = array<i64: 1, 4, 16, 16>}, {pipeline_mode = #tpu.pipeline_mode<synchronous>, transform_indices = @transform_1, window_bounds = array<i64: 2, 16, 32>}, {transform_indices = @transform_2, window_bounds = array<i64: 1, 1, 16, 64>}]} {
    %c0 = arith.constant 0 : index
    %c0_0 = arith.constant 0 : index
    %c0_1 = arith.constant 0 : index
    %c0_2 = arith.constant 0 : index
    %0 = vector.load %arg3[%c0, %c0_0, %c0_1, %c0_2] : memref<1x4x16x16xf32, #tpu.memory_space<vmem>>, vector<1x1x16x16xf32>
    %1 = vector.shape_cast %0 : vector<1x1x16x16xf32> to vector<16x16xf32>
    %c0_3 = arith.constant 0 : index
    %c0_4 = arith.constant 0 : index
    %c0_5 = arith.constant 0 : index
    %2 = vector.load %arg4[%c0_3, %c0_4, %c0_5] : memref<2x16x32xf32, #tpu.memory_space<vmem>>, vector<1x16x32xf32>
    %3 = vector.shape_cast %2 : vector<1x16x32xf32> to vector<16x32xf32>
    %cst = arith.constant dense<0.000000e+00> : vector<16x32xf32>
    %4 = tpu.matmul %1, %3, %cst {dimension_numbers = #tpu.dot_dimension_numbers<[1], [0], [0], [1], [0, 0, 1, 1], [], []>} : vector<16x16xf32>, vector<16x32xf32>, vector<16x32xf32> -> vector<16x32xf32>
    %c0_6 = arith.constant 0 : index
    %c1 = arith.constant 1 : index
    %c0_7 = arith.constant 0 : index
    %c0_8 = arith.constant 0 : index
    %5 = vector.load %arg3[%c0_6, %c1, %c0_7, %c0_8] : memref<1x4x16x16xf32, #tpu.memory_space<vmem>>, vector<1x1x16x16xf32>
    %6 = vector.shape_cast %5 : vector<1x1x16x16xf32> to vector<16x16xf32>
    %c1_9 = arith.constant 1 : index
    %c0_10 = arith.constant 0 : index
    %c0_11 = arith.constant 0 : index
    %7 = vector.load %arg4[%c1_9, %c0_10, %c0_11] : memref<2x16x32xf32, #tpu.memory_space<vmem>>, vector<1x16x32xf32>
    %8 = vector.shape_cast %7 : vector<1x16x32xf32> to vector<16x32xf32>
    %cst_12 = arith.constant dense<0.000000e+00> : vector<16x32xf32>
    %9 = tpu.matmul %6, %8, %cst_12 {dimension_numbers = #tpu.dot_dimension_numbers<[1], [0], [0], [1], [0, 0, 1, 1], [], []>} : vector<16x16xf32>, vector<16x32xf32>, vector<16x32xf32> -> vector<16x32xf32>
    %10 = arith.addf %4, %9 : vector<16x32xf32>
    %c0_13 = arith.constant 0 : index
    %c0_14 = arith.constant 0 : index
    %c0_15 = arith.constant 0 : index
    %c0_16 = arith.constant 0 : index
    %11 = vector.load %arg5[%c0_13, %c0_14, %c0_15, %c0_16] : memref<1x1x16x64xf32, #tpu.memory_space<vmem>>, vector<1x1x16x32xf32>
    %12 = vector.shape_cast %11 : vector<1x1x16x32xf32> to vector<16x32xf32>
    %13 = vector.shape_cast %10 : vector<16x32xf32> to vector<1x1x16x32xf32>
    tpu.vector_store %arg5[%c0_13, %c0_14, %c0_15, %c0_16], %13 {strides = array<i32>} : memref<1x1x16x64xf32, #tpu.memory_space<vmem>>, vector<1x1x16x32xf32>,
    %c0_17 = arith.constant 0 : index
    %c2 = arith.constant 2 : index
    %c0_18 = arith.constant 0 : index
    %c0_19 = arith.constant 0 : index
    %14 = vector.load %arg3[%c0_17, %c2, %c0_18, %c0_19] : memref<1x4x16x16xf32, #tpu.memory_space<vmem>>, vector<1x1x16x16xf32>
    %15 = vector.shape_cast %14 : vector<1x1x16x16xf32> to vector<16x16xf32>
    %c0_20 = arith.constant 0 : index
    %c0_21 = arith.constant 0 : index
    %c0_22 = arith.constant 0 : index
    %16 = vector.load %arg4[%c0_20, %c0_21, %c0_22] : memref<2x16x32xf32, #tpu.memory_space<vmem>>, vector<1x16x32xf32>
    %17 = vector.shape_cast %16 : vector<1x16x32xf32> to vector<16x32xf32>
    %cst_23 = arith.constant dense<0.000000e+00> : vector<16x32xf32>
    %18 = tpu.matmul %15, %17, %cst_23 {dimension_numbers = #tpu.dot_dimension_numbers<[1], [0], [0], [1], [0, 0, 1, 1], [], []>} : vector<16x16xf32>, vector<16x32xf32>, vector<16x32xf32> -> vector<16x32xf32>
    %c0_24 = arith.constant 0 : index
    %c3 = arith.constant 3 : index
    %c0_25 = arith.constant 0 : index
    %c0_26 = arith.constant 0 : index
    %19 = vector.load %arg3[%c0_24, %c3, %c0_25, %c0_26] : memref<1x4x16x16xf32, #tpu.memory_space<vmem>>, vector<1x1x16x16xf32>
    %20 = vector.shape_cast %19 : vector<1x1x16x16xf32> to vector<16x16xf32>
    %c1_27 = arith.constant 1 : index
    %c0_28 = arith.constant 0 : index
    %c0_29 = arith.constant 0 : index
    %21 = vector.load %arg4[%c1_27, %c0_28, %c0_29] : memref<2x16x32xf32, #tpu.memory_space<vmem>>, vector<1x16x32xf32>
    %22 = vector.shape_cast %21 : vector<1x16x32xf32> to vector<16x32xf32>
    %cst_30 = arith.constant dense<0.000000e+00> : vector<16x32xf32>
    %23 = tpu.matmul %20, %22, %cst_30 {dimension_numbers = #tpu.dot_dimension_numbers<[1], [0], [0], [1], [0, 0, 1, 1], [], []>} : vector<16x16xf32>, vector<16x32xf32>, vector<16x32xf32> -> vector<16x32xf32>
    %24 = arith.addf %18, %23 : vector<16x32xf32>
    %c0_31 = arith.constant 0 : index
    %c0_32 = arith.constant 0 : index
    %c0_33 = arith.constant 0 : index
    %c32 = arith.constant 32 : index
    %25 = vector.load %arg5[%c0_31, %c0_32, %c0_33, %c32] : memref<1x1x16x64xf32, #tpu.memory_space<vmem>>, vector<1x1x16x32xf32>
    %26 = vector.shape_cast %25 : vector<1x1x16x32xf32> to vector<16x32xf32>
    %27 = vector.shape_cast %24 : vector<16x32xf32> to vector<1x1x16x32xf32>
    tpu.vector_store %arg5[%c0_31, %c0_32, %c0_33, %c32], %27 {strides = array<i32>} : memref<1x1x16x64xf32, #tpu.memory_space<vmem>>, vector<1x1x16x32xf32>,
    return
  }
  func.func @transform_0(%arg0: i32, %arg1: i32, %arg2: i32) -> (i32, i32, i32, i32) {
    %c0_i32 = arith.constant 0 : i32
    %c0_i32_0 = arith.constant 0 : i32
    return %arg0, %arg1, %arg2, %c0_i32 : i32, i32, i32, i32
  }
  func.func @transform_1(%arg0: i32, %arg1: i32, %arg2: i32) -> (i32, i32, i32) {
    %c0_i32 = arith.constant 0 : i32
    %c0_i32_0 = arith.constant 0 : i32
    %c0_i32_1 = arith.constant 0 : i32
    %c0_i32_2 = arith.constant 0 : i32
    return %c0_i32, %c0_i32_0, %c0_i32_1 : i32, i32, i32
  }
  func.func @transform_2(%arg0: i32, %arg1: i32, %arg2: i32) -> (i32, i32, i32, i32) {
    %c0_i32 = arith.constant 0 : i32
    %c0_i32_0 = arith.constant 0 : i32
    return %arg0, %arg1, %arg2, %c0_i32 : i32, i32, i32, i32
  }
}

</mosaic_0001>

<bundles_post_ra>
// kernel: tpu_custom_call.1
= control target key start
LH: loop header
LB: loop body
LE: loop exit
PB: predicated region body
PF: predicated region fallthrough
CT: control target
= control target key end

     0   :  { %7 = vsyncpa [#allocation3], 0  ;;  %s1281_s0 = inlined_call_operand.hbm [shape: f32[2,4,16,16], index: 0, kind: input, shape index: {}]   ;;  %s1282_s1 = inlined_call_operand.hbm [shape: f32[2,16,32], index: 1, kind: input, shape index: {}]   ;;  %s1283_s2 = inlined_call_operand.hbm [shape: f32[2,1,16,64], index: 2, kind: output, shape index: {}]  }
   0x1   :  { %9 = vsyncpa [#allocation3 + $0x1], 0 }
   0x2   :  { %10 = vsyncpa [#allocation6], 0 }
   0x3   :  { %11 = vsyncpa [#allocation4], 0 }
   0x4   :  { %13 = vsyncpa [#allocation4 + $0x1], 0  ;;  %s1037_s9 = smov 0   ;;  %s1039_s10 = smov 0  }
   0x5   :  { %s1041_s11 = smov 0   ;;  %s1043_s12 = smov 0  }
   0x6   :  { %s1045_s13 = smov 0   ;;  %s1047_s14 = smov 0  }
   0x7 LB: > { %s693_s15 = sadd.s32 4294967295, %s1012_s14   ;;  %s694_s16 = sadd.s32 4294967294, %s1012_s14   ;;  %s1012_s14 = sphi %s1047_s14, %s19_s14   ;;  %s1008_s13 = sphi %s1045_s13, %s1307_s13   ;;  %s1004_s12 = sphi %s1043_s12, %s1306_s12   ;;  %s1000_s11 = sphi %s1041_s11, %s1305_s11   ;;  %s996_s10 = sphi %s1039_s10, %s1304_s10   ;;  %s992_s9 = sphi %s1037_s9, %s1303_s9  }
   0x8   : > { %p62_p0 = scmp.ne.s32.totalorder %s996_s10, %s992_s9  ;;  %p1071_p1 = scmp.eq.s32.totalorder %s693_s15, 0 }
   0x9   : > { %p1075_p2 = scmp.eq.s32.totalorder %s693_s15, 1  ;;  %p117_p3 = scmp.eq.s32.totalorder %s694_s16, 1 }
   0xa   : > { %s1288_s17 = scalar_select %p1071_p1, 1, 0 }
   0xb   : > { %s1289_s18 = scalar_select %p1075_p2, 1, 0 }
   0xc   : > { %p1081_p4 = por %p1071_p1, %p62_p0  ;;  %p695_p5 = scmp.ge.s32.totalorder %s1012_s14, 1 }
   0xd   : > { %p1086_p6 = por %p117_p3, %p62_p0  ;;  %p124_p7 = scmp.lt.s32.totalorder %s1012_s14, 3 }
   0xe   : > { %s1290_s19 = scalar_select %p1081_p4, 1, 0 }
   0xf   : > { %s1291_s20 = scalar_select %p1086_p6, 1, 0 }
  0x10   : > { %p1091_p8 = pnand %p695_p5, %p124_p7  ;;  %s1014_s22 = smov [#allocation5]  }
  0x11   : > { %s136_s23 = sshll.u32 %s1014_s22, 4  ;;  %s38_s25 = sadd.s32 1, %s1008_s13  ;;  %s137_s23 = int_to_ptr.vmem [resolvable:$true] %s136_s23 }
  0x12   : > { %s1292_s21 = scalar_select %p1091_p8, 1, 0 }
  0x13   : > { %p798_p9 = pneg %p1091_p8  ;;  %s868_s28 = scalar_lea.hbm %s1282_s1, 512 }
  0x14   : > { %p869_p12 = scmp.ne.s32.totalorder %s1282_s1, %s868_s28  ;;  %p875_p5 = scmp.lt.u32.totalorder %s868_s28, %s1282_s1 }
  0x15   : > { %p1100_p11 = pnand %p798_p9, %p1071_p1 }
  0x17   : > { %p870_p13 = pneg %p1100_p11 }
  0x19   : > { %p871_p0 = pnand %p870_p13, %p869_p12 }
  0x1b   : > { %p872_p3 = pneg %p871_p0 }
  0x1d   : > { %p877_p7 = pnand %p875_p5, %p872_p3 }
  0x1f   : > { %880 = shalt.err (!%p877_p7)
}
  0x20   : > { %s881_s5 = scalar_lea.vmem %s137_s23, 512  ;;  %p889_p1 = scmp.lt.s32.totalorder %s137_s23, %s137_s23 }
  0x21   : > { %p882_p9 = scmp.ne.s32.totalorder %s137_s23, %s881_s5  ;;  %p890_p4 = scmp.lt.s32.totalorder %s881_s5, %s881_s5 }
  0x23   : > { %p884_p10 = pnand %p882_p9, %p870_p13  ;;  %p891_p8 = por %p890_p4, %p889_p1 }
  0x25   : > { %p885_p6 = pneg %p884_p10 }
  0x27   : > { %p892_p2 = pnand %p891_p8, %p885_p6 }
  0x29   : > { %895 = shalt.err (!%p892_p2)
}
  0x2a   : > { %s1015_s6 = smov 128   ;;  %s1016_s7 = smov 8  }
  0x2b   : > { %801 = dma.hbm_to_vmem [thread:$0]  (!%p1100_p11), %s1282_s1, 512, %s137_s23, [#allocation6], %s1015_s6, %s1015_s6, %s1016_s7  }
  0x2c   : > { %p40_p1 = scmp.ge.s32.totalorder %s38_s25, 2  ;;  %s49_s16 = sadd.s32 1, %s1000_s11 }
  0x2d   : > { %p56_p2 = scmp.ne.s32.totalorder %s1000_s11, %s996_s10  ;;  %p57_p4 = scmp.eq.s32.totalorder %s1012_s14, 0 }
  0x2e   : > { %s1309_s25 = smov (%p40_p1, %s38_s25), 0  ;;  %p1295_p8 = scmp.ne.s32.totalorder %s1289_s18, 0 }
  0x2f   : > { %p1130_p6 = por %p57_p4, %p56_p2  ;;  %s42_s26 = ssub.s32 %s1008_s13, %s1309_s25 }
  0x30   : > { %p1136_p10 = por %p1295_p8, %p56_p2  ;;  %p811_p12 = scmp.lt.s32.totalorder %s1012_s14, 2 }
  0x31   : > { %p47_p11 = scmp.eq.s32.totalorder %s42_s26, 0  ;;  %s150_s23 = sand.u32 1, %s1000_s11  }
  0x32   : > { %s698_s27 = sshll.u32 %s150_s23, 6  ;;  %s724_s29 = sshll.u32 %s1008_s13, 10 }
  0x33   : > { %s1145_s28 = scalar_select %p47_p11, %s1000_s11, %s49_s16  }
  0x34   : > { %s1151_s4 = scalar_lea.hbm %s1281_s0, %s724_s29  ;;  %s154_s18 = scalar_lea.vmem [#allocation2], %s698_s27 }
  0x35   : > { %s166_s5 = sshll.u32 %s154_s18, 4  ;;  %p1157_p13 = pnand %p811_p12, %p1130_p6  ;;  %s1153_s5 = int_to_ptr.vmem [resolvable:$true] %s166_s5 }
  0x36   : > { %s1161_s15 = scalar_lea.sflag [#allocation3], %s150_s23  ;;  %s896_s16 = scalar_lea.hbm %s1151_s4, 1024 }
  0x37   : > { %p897_p0 = scmp.ne.s32.totalorder %s1151_s4, %s896_s16  ;;  %p898_p3 = pneg %p1157_p13 }
  0x38   : > { %s901_s22 = scalar_lea.hbm %s1281_s0, 2048  ;;  %p902_p9 = scmp.lt.u32.totalorder %s1151_s4, %s1281_s0 }
  0x39   : > { %p899_p5 = pnand %p898_p3, %p897_p0  ;;  %p903_p1 = scmp.lt.u32.totalorder %s901_s22, %s896_s16 }
  0x3a   : > { %p905_p4 = scmp.lt.u32.totalorder %s896_s16, %s1151_s4 }
  0x3b   : > { %p900_p7 = pneg %p899_p5  ;;  %p904_p2 = por %p903_p1, %p902_p9 }
  0x3d   : > { %p906_p6 = por %p905_p4, %p904_p2 }
  0x3f   : > { %p907_p8 = pnand %p906_p6, %p900_p7 }
  0x41   : > { %910 = shalt.err (!%p907_p8)
}
  0x42   : > { %s911_s23 = scalar_lea.vmem %s1153_s5, 1024  ;;  %s1017_s3 = smov [#allocation2]  }
  0x43   : > { %p912_p12 = scmp.ne.s32.totalorder %s1153_s5, %s911_s23  ;;  %s916_s18 = sshll.u32 %s1017_s3, 4  ;;  %s917_s18 = int_to_ptr.vmem [resolvable:$false] %s916_s18 }
  0x44   : > { %s918_s26 = scalar_lea.vmem %s917_s18, 2048  ;;  %p919_p5 = scmp.lt.s32.totalorder %s1153_s5, %s917_s18 }
  0x45   : > { %p914_p11 = pnand %p912_p12, %p898_p3  ;;  %p920_p9 = scmp.lt.s32.totalorder %s918_s26, %s911_s23 }
  0x47   : > { %p915_p0 = pneg %p914_p11  ;;  %p921_p1 = por %p920_p9, %p919_p5 }
  0x49   : > { %p922_p2 = pnand %p921_p1, %p915_p0 }
  0x4b   : > { %925 = shalt.err (!%p922_p2)
}
  0x4c   : > { %805 = dma.hbm_to_vmem [thread:$0]  (!%p1157_p13), %s1151_s4, 1024, %s1153_s5, %s1161_s15, %s1015_s6, %s1015_s6, %s1016_s7  }
  0x4d   : > { %p1298_p3 = scmp.ne.s32.totalorder %s1292_s21, 0 }
  0x4e   : > { %s1195_s16 = sand.u32 (!%p1298_p3), 1, %s996_s10   ;;  %p1299_p7 = scmp.ne.s32.totalorder (!%p1298_p3), %s1290_s19, 0 }
  0x4f   : > { %178 = sbr.rel (%p1298_p3) target bundleno = 452 (0x1c4), region = 28  ;;  %s702_s27 = sshll.u32 (!%p1298_p3), %s1195_s16, 6 }
  0x50   : > { %s181_s22 = scalar_lea.sflag (!%p1298_p3), [#allocation3], %s1195_s16  ;;  %s1199_s29 = scalar_lea.vmem (!%p1298_p3), [#allocation2], %s702_s27 }
  0x56   : > { %979 = dma.done.wait (%p1299_p7), %s181_s22, 1024  }
  0x57   : > { %981 = vsyncadd (%p1299_p7), %s181_s22, 4294966272  ;;  %p1300_p13 = scmp.ne.s32.totalorder %s1288_s17, 0 }
  0x59   : > { %983 = dma.done.wait (%p1300_p13), [#allocation6], 512  }
  0x5a   : > { %985 = vsyncadd (%p1300_p13), [#allocation6], 4294966784  ;;  %vm222_vm0 = vcmask 130048   ;;  %v396_v0 = vld [vmem:[#allocation5 + $0x10] sm:$0xff]  ;;  %v397_v1 = vld [vmem:[#allocation5 + $0x18] sm:$0xff]  ;;  %s704_s17 = sshll.u32 %s1195_s16, 4 }
  0x5b   : > { %v713_v2 = vld [vmem:[%s1199_s29 + $0x30] sm:$0xff]  ;;  %v778_v3 = vpack.c.bf16 %v397_v1, %v396_v0  ;;  %v391_v4 = vld [vmem:[#allocation5] sm:$0xff]  ;;  %v392_v5 = vld [vmem:[#allocation5 + $0x8] sm:$0xff]  ;;  %vm385_vm1 = vcmask 261120   ;;  %s208_s19 = scalar_lea.vmem [#allocation7], %s704_s17  ;;  %s1018_s21 = smov 32  }
  0x5c   : > { %760 = vmatprep.mubr.msk.f32.mxu1 %vm222_vm0, %v713_v2  ;;  %v782_v6 = vpack.c.bf16 %v392_v5, %v391_v4  ;;  %v705_v7 = vld [vmem:[%s1199_s29 + $0x10] sm:$0xff]  ;;  %v714_v8 = vld [vmem:[%s1199_s29 + $0x38] sm:$0xff]  ;;  %v711_v10 = vld [vmem:[%s1199_s29 + $0x20] sm:$0xff]  ;;  %vm568_vm2 = vcmask 523520   ;;  %s725_s6 = sshll.u32 %s1004_s12, 8  ;;  %s589_s7 = sshll.u32 %s208_s19, 4  ;;  %s1232_s7 = int_to_ptr.vmem [resolvable:$true] %s589_s7 }
  0x5d   : > { %779 = vmatprep.subr.bf16.mxu1 %v778_v3  ;;  %771 = vmatprep.subr.bf16.mxu0 %v778_v3  ;;  %v706_v9 = vld [vmem:[%s1199_s29 + $0x18] sm:$0xff]  ;;  %v212_v11 = vld [vmem:[%s1199_s29] sm:$0xff]  ;;  %v712_v12 = vld [vmem:[%s1199_s29 + $0x28] sm:$0xff]  ;;  %s1230_s8 = scalar_lea.hbm %s1283_s2, %s725_s6  ;;  %s572_s15 = scalar_lea.sflag [#allocation4], %s1195_s16 }
  0x5e   : > { %781 = vmatpush3.bf16.msra.mxu1 %v778_v3  ;;  %773 = vmatpush3.bf16.msra.mxu0 %v778_v3  ;;  %v213_v13 = vld [vmem:[%s1199_s29 + $0x8] sm:$0xff]  ;;  %s926_s30 = scalar_lea.vmem %s1232_s7, 256  ;;  %s1019_s12 = smov [#allocation7]  }
  0x5f   : > { %783 = vmatprep.subr.bf16.mxu1 %v782_v6  ;;  %746 = vmatprep.mubr.msk.f32.mxu0 %vm222_vm0, %v705_v7  ;;  %p927_p4 = scmp.ne.s32.totalorder %s1232_s7, %s926_s30  ;;  %s930_s23 = sshll.u32 %s1019_s12, 4  ;;  %s931_s23 = int_to_ptr.vmem [resolvable:$false] %s930_s23 }
  0x60   : > { %775 = vmatprep.subr.bf16.mxu0 %v782_v6  ;;  %s932_s3 = scalar_lea.vmem %s931_s23, 512  ;;  %p933_p12 = scmp.lt.s32.totalorder %s1232_s7, %s931_s23 }
  0x61   : > { %761 = vmatmul.mubr.msk.f32.vlgmr.msra.gmra.mrb[0].mxu1 %vm222_vm0, %v714_v8  ;;  %747 = vmatmul.mubr.msk.f32.vlgmr.msra.gmra.mrb[0].mxu0 %vm222_vm0, %v706_v9  ;;  %p928_p6 = pnand %p927_p4, %p1136_p10  ;;  %p934_p11 = scmp.lt.s32.totalorder %s932_s3, %s926_s30 }
  0x62   : > { %785 = vmatpush3.bf16.msra.mxu1 %v782_v6  ;;  %767 = vmatprep.mubr.msk.f32.mxu1 %vm222_vm0, %v711_v10 }
  0x63   : > { %777 = vmatpush3.bf16.msra.mxu0 %v782_v6  ;;  %753 = vmatprep.mubr.msk.f32.mxu0 %vm222_vm0, %v212_v11  ;;  %p929_p8 = pneg %p928_p6  ;;  %p935_p0 = por %p934_p11, %p933_p12 }
  0x65   : > { %p936_p5 = pnand %p935_p0, %p929_p8 }
  0x69   : > { %768 = vmatmul.mubr.msk.f32.vlgmr.msra.gmra.mrb[0].mxu1 %vm222_vm0, %v712_v12  ;;  %754 = vmatmul.mubr.msk.f32.vlgmr.msra.gmra.mrb[0].mxu0 %vm222_vm0, %v213_v13 }
 0x13c   : > { %v769_v14 = vpop.f32.mrb[0].mxu1  ;;  %v755_v15 = vpop.f32.mrb[0].mxu0 }
 0x13d   : > { %v551_v16 = vpop.f32.mrb[1].mxu1  ;;  %387 = vst.msk [vmem:[%s208_s19 + $0x8] sm:$0xff] %vm385_vm1, %v755_v15  ;;  %v376_v17 = vpop.f32.mrb[1].mxu0 }
 0x13e   : > { %562 = vrot.lane.b32.xlu0 %v551_v16, %s1018_s21  ;;  %386 = vst.msk [vmem:[%s208_s19] sm:$0xff] %vm385_vm1, %v376_v17 }
 0x142   : > { %564 = vrot.lane.b32.xlu0 %v769_v14, %s1018_s21 }
 0x1b0   : > { %v563_v18 = vpop.permute.xlu0 %562 }
 0x1b1   : > { %569 = vst.msk [vmem:[%s208_s19] sm:$0xff] %vm568_vm2, %v563_v18 }
 0x1b4   : > { %v565_v19 = vpop.permute.xlu0 %564 }
 0x1b5   : > { %570 = vst.msk [vmem:[%s208_s19 + $0x8] sm:$0xff] %vm568_vm2, %v565_v19 }
 0x1b6   : > { %939 = shalt.err (!%p936_p5)
}
 0x1b7   : > { %s940_s18 = scalar_lea.hbm %s1230_s8, 256  ;;  %s944_s22 = scalar_lea.hbm %s1283_s2, 512 }
 0x1b8   : > { %p941_p9 = scmp.ne.s32.totalorder %s1230_s8, %s940_s18  ;;  %p945_p3 = scmp.lt.u32.totalorder %s1230_s8, %s1283_s2 }
 0x1b9   : > { %p946_p7 = scmp.lt.u32.totalorder %s944_s22, %s940_s18  ;;  %p948_p4 = scmp.lt.u32.totalorder %s940_s18, %s1230_s8 }
 0x1ba   : > { %p942_p1 = pnand %p941_p9, %p1136_p10 }
 0x1bb   : > { %p947_p13 = por %p946_p7, %p945_p3 }
 0x1bc   : > { %p943_p2 = pneg %p942_p1 }
 0x1bd   : > { %p949_p6 = por %p948_p4, %p947_p13 }
 0x1bf   : > { %p950_p8 = pnand %p949_p6, %p943_p2 }
 0x1c1   : > { %953 = shalt.err (!%p950_p8)
}
 0x1c2   : > { %s1020_s19 = smov 128   ;;  %s1021_s21 = smov 8  }
 0x1c3   : > { %796 = dma.vmem_to_hbm [thread:$0]  (%p1136_p10), %s1232_s7, 256, %s1230_s8, %s572_s15, %s1020_s19, %s1020_s19, %s1021_s21  }
 0x1c4 PF: > { %s604_s6 = sand.u32 1, %s992_s9   ;;  %p1301_p12 = scmp.ne.s32.totalorder %s1291_s20, 0 }
 0x1c5   : > { %p1302_p11 = scmp.ge.s32.totalorder %s1012_s14, 2  ;;  %s605_s4 = scalar_lea.sflag [#allocation4], %s604_s6 }
 0x1c7   : > { %p807_p0 = pnand %p1302_p11, %p1301_p12 }
 0x1c9   : > { %987 = dma.done.wait (!%p807_p0), %s605_s4, 256  }
 0x1ca   : > { %989 = vsyncadd (!%p807_p0), %s605_s4, 4294967040  ;;  %s19_s14 = sadd.s32 1, %s1012_s14   ;;  %s1303_s9 = smov %s996_s10 }
 0x1cb   : > { %p16_p5 = scmp.ge.s32.totalorder %s19_s14, 4   ;;  %s1304_s10 = smov %s1000_s11 }
 0x1cc   : > { %s1305_s11 = smov %s1145_s28  ;;  %s1306_s12 = smov %s1008_s13 }
 0x1cd   : > { %s1307_s13 = smov %s1309_s25  ;;  %18 = sbr.rel (!%p16_p5) target bundleno = 7 (0x7), region = 81 }
 0x1d4   :  { %610 = vsyncpa [#allocation3], 1 }
 0x1d5   :  { %612 = vsyncpa [#allocation3 + $0x1], 1 }
 0x1d6   :  { %613 = vsyncpa [#allocation6], 1 }
 0x1d7   :  { %614 = vsyncpa [#allocation4], 1 }
 0x1d8   :  { %616 = vsyncpa [#allocation4 + $0x1], 1 }

</bundles_post_ra>
